<compile_context>
chip_gen: v7x
topology: tpu7x:2x2x1
jax: 0.10.0
libtpu: 0.0.40
codegen_flags: <defaults>
</compile_context>

<pallas_src>
import jax
import jax.numpy as jnp
from jax.experimental import pallas as pl
from jax.experimental.pallas import tpu as pltpu


def _round_up(x, m):
    return ((x + m - 1) // m) * m


def critic_kernel(x_ref, w14_ref, b14_ref,
                  w2_ref, b2_ref, w5_ref, b5_ref,
                  w36_ref, b36_ref,
                  out_ref):
    hidden = w2_ref.shape[0]
    x = x_ref[...]                                   # (tb, D) bf16

    # ----- Head 1 end-to-end (keeps the live f32 intermediate to (tb, 256)) ---
    h = (jnp.dot(x, w14_ref[:, :hidden], preferred_element_type=jnp.float32)
         + b14_ref[:, :hidden])
    h = jnp.maximum(h, 0.0).astype(jnp.bfloat16)
    h2 = jnp.maximum(
        jnp.dot(h, w2_ref[...], preferred_element_type=jnp.float32) + b2_ref[...], 0.0)
    # Output layer (N=1): VPU multiply + lane reduction, SMEM scalar bias.
    q1 = jnp.sum(h2 * w36_ref[0:1, :], axis=-1, keepdims=True) + b36_ref[0]

    # ----- Head 2 end-to-end ---------------------------------------------------
    g = (jnp.dot(x, w14_ref[:, hidden:], preferred_element_type=jnp.float32)
         + b14_ref[:, hidden:])
    g = jnp.maximum(g, 0.0).astype(jnp.bfloat16)
    g2 = jnp.maximum(
        jnp.dot(g, w5_ref[...], preferred_element_type=jnp.float32) + b5_ref[...], 0.0)
    q2 = jnp.sum(g2 * w36_ref[1:2, :], axis=-1, keepdims=True) + b36_ref[1]

    # Lane-stacked output [tb, 2]: one store instead of two 1-lane stores.
    out_ref[...] = jnp.concatenate([q1, q2], axis=1).astype(out_ref.dtype)


def critic_forward(state, action, params, block_b=1024):
    """Pallas forward. Returns (q1, q2), each [batch, 1] float32 (matches Critic.forward)."""
    B = state.shape[0]
    hidden = params["w2"].shape[0]

    # Fused input: concat + cast to the weight dtype in one wrapper op (halves
    # input DMA bytes vs f32; matmul still accumulates in f32).
    x = jnp.concatenate([state, action], axis=1).astype(params["w14"].dtype)
    D = x.shape[1]

    # Near-equal batch tiles rounded up to 16 rows (bf16 sublane packing).
    # Force >=2 grid steps when there is enough work so a v7x megacore can
    # shard the "parallel" batch axis across both TensorCores.
    n_tiles = pl.cdiv(B, block_b)
    if n_tiles == 1 and B >= 256:
        n_tiles = 2
    tb = _round_up(pl.cdiv(B, n_tiles), 16)
    Bp = tb * n_tiles
    if Bp != B:
        x = jnp.pad(x, ((0, Bp - B), (0, 0)))

    resident = lambda i: (0, 0)   # weights/biases: same block every step -> VMEM-resident

    flops = 2 * Bp * (D * 2 * hidden + 2 * hidden * hidden + 2 * hidden)
    bytes_accessed = (int(x.size) * x.dtype.itemsize
                      + sum(int(v.size) * v.dtype.itemsize for v in params.values())
                      + Bp * 2 * 4)

    out = pl.pallas_call(
        critic_kernel,
        out_shape=jax.ShapeDtypeStruct((Bp, 2), jnp.float32),
        grid=(n_tiles,),
        in_specs=[
            pl.BlockSpec((tb, D), lambda i: (i, 0)),        # fused (state|action) tile, bf16
            pl.BlockSpec((D, 2 * hidden), resident),        # (W1||W4), bf16
            pl.BlockSpec((1, 2 * hidden), resident),        # (b1||b4), f32
            pl.BlockSpec((hidden, hidden), resident),       # W2, bf16
            pl.BlockSpec((1, hidden), resident),            # b2, f32
            pl.BlockSpec((hidden, hidden), resident),       # W5, bf16
            pl.BlockSpec((1, hidden), resident),            # b5, f32
            pl.BlockSpec((2, hidden), resident),            # W3/W6 rows, f32 (VPU path)
            pl.BlockSpec(memory_space=pltpu.SMEM),          # (b3, b6) scalars
        ],
        out_specs=pl.BlockSpec((tb, 2), lambda i: (i, 0)),
        compiler_params=pltpu.CompilerParams(
            dimension_semantics=("parallel",)),
        cost_estimate=pl.CostEstimate(
            flops=flops, transcendentals=0, bytes_accessed=bytes_accessed),
    )(x,
      params["w14"], params["b14"],
      params["w2"], params["b2"], params["w5"], params["b5"],
      params["w36"], params["b36"])

    out = out[:B]
    return out[:, 0:1], out[:, 1:2]


def init_linear(key, fan_in, fan_out):
    """Mimics torch.nn.Linear default init; weight stored [fan_in, fan_out] (transposed vs torch)."""
    kw, kb = jax.random.split(key)
    bound = 1.0 / jnp.sqrt(jnp.float32(fan_in))
    w = jax.random.uniform(kw, (fan_in, fan_out), jnp.float32, -bound, bound)
    b = jax.random.uniform(kb, (1, fan_out), jnp.float32, -bound, bound)
    return w, b


def init_critic_params(key, state_dim, action_dim, hidden=256, w_dtype=jnp.bfloat16):
    """Returns (packed_params_for_kernel, raw_f32_params_matching_torch_layout)."""
    d = state_dim + action_dim
    keys = jax.random.split(key, 6)
    w1, b1 = init_linear(keys[0], d, hidden)
    w2, b2 = init_linear(keys[1], hidden, hidden)
    w3, b3 = init_linear(keys[2], hidden, 1)
    w4, b4 = init_linear(keys[3], d, hidden)
    w5, b5 = init_linear(keys[4], hidden, hidden)
    w6, b6 = init_linear(keys[5], hidden, 1)
    raw = (w1, b1, w2, b2, w3, b3, w4, b4, w5, b5, w6, b6)

    packed = dict(
        w14=jnp.concatenate([w1, w4], axis=1).astype(w_dtype),   # [d, 2*hidden]
        b14=jnp.concatenate([b1, b4], axis=1),                   # [1, 2*hidden], f32
        w2=w2.astype(w_dtype), b2=b2,
        w5=w5.astype(w_dtype), b5=b5,
        w36=jnp.concatenate([w3.T, w6.T], axis=0),               # [2, hidden], f32 (VPU)
        b36=jnp.concatenate([b3.reshape(-1), b6.reshape(-1)]),   # [2], f32, SMEM
    )
    return packed, raw


def critic_forward_ref_packed(state, action, p):
    """Pure-JAX reference with the same bf16/f32 mixed precision as the kernel."""
    hidden = p["w2"].shape[0]
    x = jnp.concatenate([state, action], axis=1).astype(p["w14"].dtype)
    y = jnp.dot(x, p["w14"], preferred_element_type=jnp.float32) + p["b14"]
    y = jnp.maximum(y, 0.0)
    h = y[:, :hidden].astype(jnp.bfloat16)
    g = y[:, hidden:].astype(jnp.bfloat16)
    h2 = jnp.maximum(jnp.dot(h, p["w2"], preferred_element_type=jnp.float32) + p["b2"], 0.0)
    g2 = jnp.maximum(jnp.dot(g, p["w5"], preferred_element_type=jnp.float32) + p["b5"], 0.0)
    q1 = jnp.sum(h2 * p["w36"][0:1], axis=-1, keepdims=True) + p["b36"][0]
    q2 = jnp.sum(g2 * p["w36"][1:2], axis=-1, keepdims=True) + p["b36"][1]
    return q1, q2


def critic_forward_ref_f32(state, action, raw):
    """Full-f32 reference matching the original torch Critic.forward semantics."""
    (w1, b1, w2, b2, w3, b3, w4, b4, w5, b5, w6, b6) = raw
    x = jnp.concatenate([state, action], axis=1)
    h = jax.nn.relu(x @ w1 + b1)
    h = jax.nn.relu(h @ w2 + b2)
    q1 = h @ w3 + b3
    g = jax.nn.relu(x @ w4 + b4)
    g = jax.nn.relu(g @ w5 + b5)
    q2 = g @ w6 + b6
    return q1, q2


if __name__ == "__main__":
    key = jax.random.PRNGKey(0)
    k_state, k_action, k_params, k_state2, k_action2 = jax.random.split(key, 5)

    # Small shapes consistent with the module (state_dim + action_dim = 32).
    batch, state_dim, action_dim = 8, 24, 8
    state = jax.random.normal(k_state, (batch, state_dim), jnp.float32)
    action = jax.random.normal(k_action, (batch, action_dim), jnp.float32)
    packed, raw = init_critic_params(k_params, state_dim, action_dim)

    q1, q2 = critic_forward(state, action, packed)
    q1, q2 = jax.block_until_ready((q1, q2))

    q1p, q2p = critic_forward_ref_packed(state, action, packed)
    q1f, q2f = critic_forward_ref_f32(state, action, raw)

    assert q1.shape == (batch, 1) and q2.shape == (batch, 1)
    # Bit-level-close to the same-precision reference.
    assert jnp.allclose(q1, q1p, atol=1e-3, rtol=1e-3)
    assert jnp.allclose(q2, q2p, atol=1e-3, rtol=1e-3)
    # Close to the full-f32 torch-equivalent forward (bf16 weight/input rounding only).
    assert jnp.allclose(q1, q1f, atol=5e-2, rtol=5e-2)
    assert jnp.allclose(q2, q2f, atol=5e-2, rtol=5e-2)

    # Second check: batch not divisible by the tile, multi-step grid + near-equal
    # remainder tiling (B=300, block_b=128 -> 3 tiles of 112 rows).
    batch2 = 300
    state2 = jax.random.normal(k_state2, (batch2, state_dim), jnp.float32)
    action2 = jax.random.normal(k_action2, (batch2, action_dim), jnp.float32)
    q1b, q2b = critic_forward(state2, action2, packed, block_b=128)
    q1b, q2b = jax.block_until_ready((q1b, q2b))
    q1br, q2br = critic_forward_ref_packed(state2, action2, packed)
    assert q1b.shape == (batch2, 1) and q2b.shape == (batch2, 1)
    assert jnp.allclose(q1b, q1br, atol=1e-3, rtol=1e-3)
    assert jnp.allclose(q2b, q2br, atol=1e-3, rtol=1e-3)

    # Third check: default block_b with B>=256 exercises the forced >=2-step grid
    # (megacore sharding path) and its padding.
    q1c, q2c = critic_forward(state2, action2, packed)
    q1c, q2c = jax.block_until_ready((q1c, q2c))
    assert jnp.allclose(q1c, q1br, atol=1e-3, rtol=1e-3)
    assert jnp.allclose(q2c, q2br, atol=1e-3, rtol=1e-3)

    print("KERNEL_OK")
</pallas_src>

<mosaic_0001>
module attributes {stable_mosaic.version = 11 : i64} {
  func.func @critic_kernel(%arg0: i32, %arg1: memref<16x32xbf16, #tpu.memory_space<vmem>>, %arg2: memref<32x512xbf16, #tpu.memory_space<vmem>>, %arg3: memref<1x512xf32, #tpu.memory_space<vmem>>, %arg4: memref<256x256xbf16, #tpu.memory_space<vmem>>, %arg5: memref<1x256xf32, #tpu.memory_space<vmem>>, %arg6: memref<256x256xbf16, #tpu.memory_space<vmem>>, %arg7: memref<1x256xf32, #tpu.memory_space<vmem>>, %arg8: memref<2x256xf32, #tpu.memory_space<vmem>>, %arg9: memref<2xf32, #tpu.memory_space<smem>>, %arg10: memref<16x2xf32, #tpu.memory_space<vmem>>) attributes {dimension_semantics = [#tpu.dimension_semantics<parallel>], iteration_bounds = array<i64: 1>, scalar_prefetch = 0 : i64, scratch_operands = 0 : i64, tpu.core_type = #tpu.core_type<tc>, window_params = [{transform_indices = @transform_0, window_bounds = array<i64: 16, 32>}, {pipeline_mode = #tpu.pipeline_mode<synchronous>, transform_indices = @transform_1, window_bounds = array<i64: 32, 512>}, {pipeline_mode = #tpu.pipeline_mode<synchronous>, transform_indices = @transform_2, window_bounds = array<i64: 1, 512>}, {pipeline_mode = #tpu.pipeline_mode<synchronous>, transform_indices = @transform_3, window_bounds = array<i64: 256, 256>}, {pipeline_mode = #tpu.pipeline_mode<synchronous>, transform_indices = @transform_4, window_bounds = array<i64: 1, 256>}, {pipeline_mode = #tpu.pipeline_mode<synchronous>, transform_indices = @transform_5, window_bounds = array<i64: 256, 256>}, {pipeline_mode = #tpu.pipeline_mode<synchronous>, transform_indices = @transform_6, window_bounds = array<i64: 1, 256>}, {pipeline_mode = #tpu.pipeline_mode<synchronous>, transform_indices = @transform_7, window_bounds = array<i64: 2, 256>}, {transform_indices = @transform_8, window_bounds = array<i64: 2>}, {transform_indices = @transform_9, window_bounds = array<i64: 16, 2>}]} {
    %c0 = arith.constant 0 : index
    %c0_0 = arith.constant 0 : index
    %0 = vector.load %arg1[%c0, %c0_0] : memref<16x32xbf16, #tpu.memory_space<vmem>>, vector<16x32xbf16>
    %c0_1 = arith.constant 0 : index
    %c0_2 = arith.constant 0 : index
    %1 = vector.load %arg2[%c0_1, %c0_2] : memref<32x512xbf16, #tpu.memory_space<vmem>>, vector<32x256xbf16>
    %cst = arith.constant dense<0.000000e+00> : vector<16x256xf32>
    %2 = tpu.matmul %0, %1, %cst {dimension_numbers = #tpu.dot_dimension_numbers<[1], [0], [0], [1], [0, 0, 1, 1], [], []>} : vector<16x32xbf16>, vector<32x256xbf16>, vector<16x256xf32> -> vector<16x256xf32>
    %c0_3 = arith.constant 0 : index
    %c0_4 = arith.constant 0 : index
    %3 = vector.load %arg3[%c0_3, %c0_4] : memref<1x512xf32, #tpu.memory_space<vmem>>, vector<1x256xf32>
    %4 = vector.broadcast %3 : vector<1x256xf32> to vector<16x256xf32>
    %5 = arith.addf %2, %4 : vector<16x256xf32>
    %cst_5 = arith.constant 0.000000e+00 : f32
    %6 = vector.broadcast %cst_5 : f32 to vector<16x256xf32>
    %7 = arith.maximumf %5, %6 : vector<16x256xf32>
    %8 = arith.truncf %7 : vector<16x256xf32> to vector<16x256xbf16>
    %c0_6 = arith.constant 0 : index
    %c0_7 = arith.constant 0 : index
    %9 = vector.load %arg4[%c0_6, %c0_7] : memref<256x256xbf16, #tpu.memory_space<vmem>>, vector<256x256xbf16>
    %cst_8 = arith.constant dense<0.000000e+00> : vector<16x256xf32>
    %10 = tpu.matmul %8, %9, %cst_8 {dimension_numbers = #tpu.dot_dimension_numbers<[1], [0], [0], [1], [0, 0, 1, 1], [], []>} : vector<16x256xbf16>, vector<256x256xbf16>, vector<16x256xf32> -> vector<16x256xf32>
    %c0_9 = arith.constant 0 : index
    %c0_10 = arith.constant 0 : index
    %11 = vector.load %arg5[%c0_9, %c0_10] : memref<1x256xf32, #tpu.memory_space<vmem>>, vector<1x256xf32>
    %12 = vector.broadcast %11 : vector<1x256xf32> to vector<16x256xf32>
    %13 = arith.addf %10, %12 : vector<16x256xf32>
    %cst_11 = arith.constant 0.000000e+00 : f32
    %14 = vector.broadcast %cst_11 : f32 to vector<16x256xf32>
    %15 = arith.maximumf %13, %14 : vector<16x256xf32>
    %c0_12 = arith.constant 0 : index
    %c0_13 = arith.constant 0 : index
    %16 = vector.load %arg8[%c0_12, %c0_13] : memref<2x256xf32, #tpu.memory_space<vmem>>, vector<1x256xf32>
    %17 = vector.broadcast %16 : vector<1x256xf32> to vector<16x256xf32>
    %18 = arith.mulf %15, %17 : vector<16x256xf32>
    %cst_14 = arith.constant dense<0.000000e+00> : vector<16xf32>
    %19 = vector.multi_reduction <add>, %18, %cst_14 [1] : vector<16x256xf32> to vector<16xf32>
    %20 = vector.shape_cast %19 : vector<16xf32> to vector<16x1xf32>
    %c0_15 = arith.constant 0 : index
    %21 = memref.load %arg9[%c0_15] : memref<2xf32, #tpu.memory_space<smem>>
    %22 = vector.broadcast %21 : f32 to vector<16x1xf32>
    %23 = arith.addf %20, %22 : vector<16x1xf32>
    %c0_16 = arith.constant 0 : index
    %c256 = arith.constant 256 : index
    %24 = vector.load %arg2[%c0_16, %c256] : memref<32x512xbf16, #tpu.memory_space<vmem>>, vector<32x256xbf16>
    %cst_17 = arith.constant dense<0.000000e+00> : vector<16x256xf32>
    %25 = tpu.matmul %0, %24, %cst_17 {dimension_numbers = #tpu.dot_dimension_numbers<[1], [0], [0], [1], [0, 0, 1, 1], [], []>} : vector<16x32xbf16>, vector<32x256xbf16>, vector<16x256xf32> -> vector<16x256xf32>
    %c0_18 = arith.constant 0 : index
    %c256_19 = arith.constant 256 : index
    %26 = vector.load %arg3[%c0_18, %c256_19] : memref<1x512xf32, #tpu.memory_space<vmem>>, vector<1x256xf32>
    %27 = vector.broadcast %26 : vector<1x256xf32> to vector<16x256xf32>
    %28 = arith.addf %25, %27 : vector<16x256xf32>
    %cst_20 = arith.constant 0.000000e+00 : f32
    %29 = vector.broadcast %cst_20 : f32 to vector<16x256xf32>
    %30 = arith.maximumf %28, %29 : vector<16x256xf32>
    %31 = arith.truncf %30 : vector<16x256xf32> to vector<16x256xbf16>
    %c0_21 = arith.constant 0 : index
    %c0_22 = arith.constant 0 : index
    %32 = vector.load %arg6[%c0_21, %c0_22] : memref<256x256xbf16, #tpu.memory_space<vmem>>, vector<256x256xbf16>
    %cst_23 = arith.constant dense<0.000000e+00> : vector<16x256xf32>
    %33 = tpu.matmul %31, %32, %cst_23 {dimension_numbers = #tpu.dot_dimension_numbers<[1], [0], [0], [1], [0, 0, 1, 1], [], []>} : vector<16x256xbf16>, vector<256x256xbf16>, vector<16x256xf32> -> vector<16x256xf32>
    %c0_24 = arith.constant 0 : index
    %c0_25 = arith.constant 0 : index
    %34 = vector.load %arg7[%c0_24, %c0_25] : memref<1x256xf32, #tpu.memory_space<vmem>>, vector<1x256xf32>
    %35 = vector.broadcast %34 : vector<1x256xf32> to vector<16x256xf32>
    %36 = arith.addf %33, %35 : vector<16x256xf32>
    %cst_26 = arith.constant 0.000000e+00 : f32
    %37 = vector.broadcast %cst_26 : f32 to vector<16x256xf32>
    %38 = arith.maximumf %36, %37 : vector<16x256xf32>
    %c1 = arith.constant 1 : index
    %c0_27 = arith.constant 0 : index
    %39 = vector.load %arg8[%c1, %c0_27] : memref<2x256xf32, #tpu.memory_space<vmem>>, vector<1x256xf32>
    %40 = vector.broadcast %39 : vector<1x256xf32> to vector<16x256xf32>
    %41 = arith.mulf %38, %40 : vector<16x256xf32>
    %cst_28 = arith.constant dense<0.000000e+00> : vector<16xf32>
    %42 = vector.multi_reduction <add>, %41, %cst_28 [1] : vector<16x256xf32> to vector<16xf32>
    %43 = vector.shape_cast %42 : vector<16xf32> to vector<16x1xf32>
    %c1_29 = arith.constant 1 : index
    %44 = memref.load %arg9[%c1_29] : memref<2xf32, #tpu.memory_space<smem>>
    %45 = vector.broadcast %44 : f32 to vector<16x1xf32>
    %46 = arith.addf %43, %45 : vector<16x1xf32>
    %47 = tpu.concatenate %23, %46 in 1 : vector<16x1xf32>, vector<16x1xf32> -> vector<16x2xf32>
    %c0_30 = arith.constant 0 : index
    %c0_31 = arith.constant 0 : index
    %48 = vector.load %arg10[%c0_30, %c0_31] : memref<16x2xf32, #tpu.memory_space<vmem>>, vector<16x2xf32>
    tpu.vector_store %arg10[%c0_30, %c0_31], %47 {strides = array<i32>} : memref<16x2xf32, #tpu.memory_space<vmem>>, vector<16x2xf32>,
    return
  }
  func.func @transform_0(%arg0: i32) -> (i32, i32) {
    %c0_i32 = arith.constant 0 : i32
    %c0_i32_0 = arith.constant 0 : i32
    return %arg0, %c0_i32 : i32, i32
  }
  func.func @transform_1(%arg0: i32) -> (i32, i32) {
    %c0_i32 = arith.constant 0 : i32
    %c0_i32_0 = arith.constant 0 : i32
    %c0_i32_1 = arith.constant 0 : i32
    return %c0_i32, %c0_i32_0 : i32, i32
  }
  func.func @transform_2(%arg0: i32) -> (i32, i32) {
    %c0_i32 = arith.constant 0 : i32
    %c0_i32_0 = arith.constant 0 : i32
    %c0_i32_1 = arith.constant 0 : i32
    return %c0_i32, %c0_i32_0 : i32, i32
  }
  func.func @transform_3(%arg0: i32) -> (i32, i32) {
    %c0_i32 = arith.constant 0 : i32
    %c0_i32_0 = arith.constant 0 : i32
    %c0_i32_1 = arith.constant 0 : i32
    return %c0_i32, %c0_i32_0 : i32, i32
  }
  func.func @transform_4(%arg0: i32) -> (i32, i32) {
    %c0_i32 = arith.constant 0 : i32
    %c0_i32_0 = arith.constant 0 : i32
    %c0_i32_1 = arith.constant 0 : i32
    return %c0_i32, %c0_i32_0 : i32, i32
  }
  func.func @transform_5(%arg0: i32) -> (i32, i32) {
    %c0_i32 = arith.constant 0 : i32
    %c0_i32_0 = arith.constant 0 : i32
    %c0_i32_1 = arith.constant 0 : i32
    return %c0_i32, %c0_i32_0 : i32, i32
  }
  func.func @transform_6(%arg0: i32) -> (i32, i32) {
    %c0_i32 = arith.constant 0 : i32
    %c0_i32_0 = arith.constant 0 : i32
    %c0_i32_1 = arith.constant 0 : i32
    return %c0_i32, %c0_i32_0 : i32, i32
  }
  func.func @transform_7(%arg0: i32) -> (i32, i32) {
    %c0_i32 = arith.constant 0 : i32
    %c0_i32_0 = arith.constant 0 : i32
    %c0_i32_1 = arith.constant 0 : i32
    return %c0_i32, %c0_i32_0 : i32, i32
  }
  func.func @transform_8(%arg0: i32) -> i32 {
    %c0_i32 = arith.constant 0 : i32
    %c0_i32_0 = arith.constant 0 : i32
    return %c0_i32 : i32
  }
  func.func @transform_9(%arg0: i32) -> (i32, i32) {
    %c0_i32 = arith.constant 0 : i32
    %c0_i32_0 = arith.constant 0 : i32
    return %arg0, %c0_i32 : i32, i32
  }
}

</mosaic_0001>

<bundles_post_ra>
// kernel: tpu_custom_call.1
= control target key start
LH: loop header
LB: loop body
LE: loop exit
PB: predicated region body
PF: predicated region fallthrough
CT: control target
= control target key end

     0   :  { %14 = vsyncpa [#allocation3], 0  ;;  %s1294_s0 = inlined_call_operand.hbm [shape: bf16[16,32], index: 0, kind: input, shape index: {}]   ;;  %s1295_s1 = inlined_call_operand.hbm [shape: bf16[32,512], index: 1, kind: input, shape index: {}]   ;;  %s1296_s2 = inlined_call_operand.vmem [shape: f32[1,512], index: 2, kind: input, shape index: {}]   ;;  %s1297_s3 = inlined_call_operand.hbm [shape: bf16[256,256], index: 3, kind: input, shape index: {}]   ;;  %s1298_s4 = inlined_call_operand.vmem [shape: f32[1,256], index: 4, kind: input, shape index: {}]   ;;  %s1299_s5 = inlined_call_operand.hbm [shape: bf16[256,256], index: 5, kind: input, shape index: {}]   ;;  %s1300_s6 = inlined_call_operand.vmem [shape: f32[1,256], index: 6, kind: input, shape index: {}]   ;;  %s1301_s7 = inlined_call_operand.vmem [shape: f32[2,256], index: 7, kind: input, shape index: {}]   ;;  %s1302_s8 = inlined_call_operand.vmem [shape: f32[2], index: 8, kind: input, shape index: {}]   ;;  %s1303_s9 = inlined_call_operand.vmem [shape: f32[16,2], index: 9, kind: output, shape index: {}]  }
   0x1   :  { %15 = vsyncpa [#allocation6], 0 }
   0x2   :  { %16 = vsyncpa [#allocation9], 0 }
   0x3   :  { %17 = vsyncpa [#allocation4], 0  ;;  %s1157_s30 = smov [#allocation5]   ;;  %s1049_s13 = scalar_lea.hbm %s1295_s1, 1024 }
   0x4   :  { %s35_s10 = sshll.u32 %s1157_s30, 4  ;;  %p1050_p0 = scmp.ne.s32.totalorder %s1295_s1, %s1049_s13  ;;  %s36_s10 = int_to_ptr.vmem [resolvable:$true] %s35_s10 }
   0x5   :  { %p1053_p1 = scmp.lt.u32.totalorder %s1049_s13, %s1295_s1 }
   0x7   :  { %p1055_p2 = pnand %p1053_p1, %p1050_p0 }
   0x9   :  { %1058 = shalt.err (!%p1055_p2)
}
   0xa   :  { %s1059_s18 = scalar_lea.vmem %s36_s10, 1024  ;;  %p1064_p4 = scmp.lt.s32.totalorder %s36_s10, %s36_s10 }
   0xb   :  { %p1060_p3 = scmp.ne.s32.totalorder %s36_s10, %s1059_s18  ;;  %p1065_p5 = scmp.lt.s32.totalorder %s1059_s18, %s1059_s18 }
   0xd   :  { %p1066_p6 = por %p1065_p5, %p1064_p4 }
   0xf   :  { %p1067_p7 = pnand %p1066_p6, %p1060_p3 }
  0x11   :  { %1070 = shalt.err (!%p1067_p7)
}
  0x12   :  { %s1158_s19 = smov 256   ;;  %s1159_s20 = smov 16  }
  0x13   :  { %41 = dma.hbm_to_vmem [thread:$0]  %s1295_s1, 1024, %s36_s10, [#allocation6], %s1158_s19, %s1158_s19, %s1159_s20  }
  0x14   :  { %s1160_s23 = smov [#allocation2]   ;;  %s1071_s27 = scalar_lea.hbm %s1294_s0, 128 }
  0x15   :  { %s23_s24 = sshll.u32 %s1160_s23, 4  ;;  %p1072_p8 = scmp.ne.s32.totalorder %s1294_s0, %s1071_s27  ;;  %s24_s24 = int_to_ptr.vmem [resolvable:$true] %s23_s24 }
  0x16   :  { %p1075_p9 = scmp.lt.u32.totalorder %s1071_s27, %s1294_s0 }
  0x18   :  { %p1077_p10 = pnand %p1075_p9, %p1072_p8 }
  0x1a   :  { %1080 = shalt.err (!%p1077_p10)
}
  0x1b   :  { %s1081_s12 = scalar_lea.vmem %s24_s24, 128  ;;  %p1086_p12 = scmp.lt.s32.totalorder %s24_s24, %s24_s24 }
  0x1c   :  { %p1082_p11 = scmp.ne.s32.totalorder %s24_s24, %s1081_s12  ;;  %p1087_p13 = scmp.lt.s32.totalorder %s1081_s12, %s1081_s12 }
  0x1e   :  { %p1088_p0 = por %p1087_p13, %p1086_p12 }
  0x20   :  { %p1089_p1 = pnand %p1088_p0, %p1082_p11 }
  0x22   :  { %1092 = shalt.err (!%p1089_p1)
}
  0x23   :  { %s1161_s1 = smov 64   ;;  %s1162_s10 = smov 4  }
  0x24   :  { %29 = dma.hbm_to_vmem [thread:$0]  %s1294_s0, 128, %s24_s24, [#allocation3], %s1161_s1, %s1161_s1, %s1162_s10  }
  0x25   :  { %s1163_s15 = smov [#allocation7]   ;;  %s1093_s19 = scalar_lea.hbm %s1297_s3, 4096 }
  0x26   :  { %s49_s16 = sshll.u32 %s1163_s15, 4  ;;  %p1094_p2 = scmp.ne.s32.totalorder %s1297_s3, %s1093_s19  ;;  %s50_s16 = int_to_ptr.vmem [resolvable:$true] %s49_s16 }
  0x27   :  { %p1097_p3 = scmp.lt.u32.totalorder %s1093_s19, %s1297_s3 }
  0x29   :  { %p1099_p4 = pnand %p1097_p3, %p1094_p2 }
  0x2b   :  { %1102 = shalt.err (!%p1099_p4)
}
  0x2c   :  { %s1103_s25 = scalar_lea.vmem %s50_s16, 4096  ;;  %p1108_p6 = scmp.lt.s32.totalorder %s50_s16, %s50_s16 }
  0x2d   :  { %p1104_p5 = scmp.ne.s32.totalorder %s50_s16, %s1103_s25  ;;  %p1109_p7 = scmp.lt.s32.totalorder %s1103_s25, %s1103_s25 }
  0x2f   :  { %p1110_p8 = por %p1109_p7, %p1108_p6 }
  0x31   :  { %p1111_p9 = pnand %p1110_p8, %p1104_p5 }
  0x33   :  { %1114 = shalt.err (!%p1111_p9)
}
  0x34   :  { %s1164_s0 = smov 128   ;;  %s1165_s24 = smov 8  }
  0x35   :  { %55 = dma.hbm_to_vmem [thread:$0]  %s1297_s3, 4096, %s50_s16, [#allocation6], %s1164_s0, %s1164_s0, %s1165_s24  }
  0x36   :  { %s1166_s28 = smov [#allocation8]   ;;  %s80_s12 = sshll.u32 %s1302_s8, 4  ;;  %s81_s12 = int_to_ptr.vmem [resolvable:$true] %s80_s12 }
  0x37   :  { %s63_s29 = sshll.u32 %s1166_s28, 4  ;;  %s1115_s13 = scalar_lea.hbm %s1299_s5, 4096  ;;  %s64_s29 = int_to_ptr.vmem [resolvable:$true] %s63_s29 }
  0x38   :  { %p1116_p10 = scmp.ne.s32.totalorder %s1299_s5, %s1115_s13  ;;  %p1119_p11 = scmp.lt.u32.totalorder %s1115_s13, %s1299_s5 }
  0x3a   :  { %p1121_p12 = pnand %p1119_p11, %p1116_p10 }
  0x3c   :  { %1124 = shalt.err (!%p1121_p12)
}
  0x3d   :  { %s1125_s3 = scalar_lea.vmem %s64_s29, 4096  ;;  %p1130_p0 = scmp.lt.s32.totalorder %s64_s29, %s64_s29 }
  0x3e   :  { %p1126_p13 = scmp.ne.s32.totalorder %s64_s29, %s1125_s3  ;;  %p1131_p1 = scmp.lt.s32.totalorder %s1125_s3, %s1125_s3 }
  0x40   :  { %p1132_p2 = por %p1131_p1, %p1130_p0 }
  0x42   :  { %p1133_p3 = pnand %p1132_p2, %p1126_p13 }
  0x44   :  { %1136 = shalt.err (!%p1133_p3)
}
  0x45   :  { %69 = dma.hbm_to_vmem [thread:$0]  %s1299_s5, 4096, %s64_s29, [#allocation9], %s1164_s0, %s1164_s0, %s1165_s24  }
  0x46   :  { %s1137_s19 = scalar_lea.vmem %s81_s12, 16  ;;  %p1142_p5 = scmp.lt.s32.totalorder %s81_s12, %s81_s12 }
  0x47   :  { %p1138_p4 = scmp.ne.s32.totalorder %s81_s12, %s1137_s19  ;;  %p1143_p6 = scmp.lt.s32.totalorder %s1137_s19, %s1137_s19 }
  0x49   :  { %p1144_p7 = por %p1143_p6, %p1142_p5 }
  0x4b   :  { %p1145_p8 = pnand %p1144_p7, %p1138_p4 }
  0x4d   :  { %1148 = shalt.err (!%p1145_p8)
}
  0x4e   :  { %s1167_s20 = smov [#allocation10]  }
  0x4f   :  { %83 = dma.vmem_to_smem %s81_s12, 16, %s1167_s20, [#allocation4]  }
  0x50   :  { %1149 = dma.done.wait [#allocation3], 128  }
  0x51   :  { %1150 = vsyncadd [#allocation3], 4294967168 }
  0x52   :  { %1151 = dma.done.wait [#allocation6], 5120  }
  0x53   :  { %1152 = vsyncadd [#allocation6], 4294962176 }
  0x54   :  { %1153 = dma.done.wait [#allocation9], 4096  }
  0x55   :  { %1154 = vsyncadd [#allocation9], 4294963200 }
  0x56   :  { %1155 = dma.done.wait [#allocation4], 16  }
  0x57   :  { %1156 = vsyncadd [#allocation4], 4294967280 }
  0x58   :  { %99 = sfence }
  0x59   :  { %v940_v0 = vld [vmem:[#allocation5 + $0x4] ss:$16 sps:$4 sm:$0xff]   ;;  %v942_v1 = vld [vmem:[#allocation5 + $0xc] ss:$16 sps:$4 sm:$0xff]   ;;  %v1168_v2 = vmov 0   ;;  %vm144_vm0 = vcmask 261120  }
  0x5a   :  { %180 = vmatprep.mubr.bf16.mxu1 %v1168_v2  ;;  %542 = vmatprep.mubr.bf16.mxu0 %v1168_v2  ;;  %v944_v3 = vld [vmem:[#allocation5] ss:$16 sps:$4 sm:$0xff]   ;;  %v945_v4 = vld [vmem:[#allocation5 + $0x8] ss:$16 sps:$4 sm:$0xff]   ;;  %v946_v5 = vld [vmem:[#allocation5 + $0x24] ss:$16 sps:$4 sm:$0xff]  }
  0x5b   :  { %148 = vmatprep.subr.bf16.mxu1 %v940_v0  ;;  %510 = vmatprep.subr.bf16.mxu0 %v942_v1  ;;  %v948_v6 = vld [vmem:[#allocation5 + $0x2c] ss:$16 sps:$4 sm:$0xff]   ;;  %v950_v7 = vld [vmem:[#allocation5 + $0x20] ss:$16 sps:$4 sm:$0xff]   ;;  %v951_v8 = vld [vmem:[#allocation5 + $0x28] ss:$16 sps:$4 sm:$0xff]  }
  0x5c   :  { %149 = vmatpush1.bf16.msra.mxu1 %v944_v3  ;;  %511 = vmatpush1.bf16.msra.mxu0 %v945_v4  ;;  %v952_v9 = vld [vmem:[#allocation2] sm:$0xff]   ;;  %v953_v10 = vld [vmem:[#allocation7] ss:$8 sps:$4 sm:$0xff]   ;;  %v955_v11 = vld [vmem:[#allocation7 + $0x4] ss:$8 sps:$4 sm:$0xff]   ;;  %vm837_vm1 = vcmask 7168  }
  0x5d   :  { %150 = vmatprep.subr.bf16.mxu1 %v946_v5  ;;  %512 = vmatprep.subr.bf16.mxu0 %v948_v6  ;;  %v956_v12 = vld [vmem:[#allocation8] ss:$8 sps:$4 sm:$0xff]   ;;  %v958_v13 = vld [vmem:[#allocation8 + $0x4] ss:$8 sps:$4 sm:$0xff]   ;;  %v961_v14 = vld [vmem:[#allocation7 + $0x14] ss:$8 sps:$4 sm:$0xff]  }
  0x5e   :  { %v964_v15 = vld [vmem:[#allocation8 + $0x14] ss:$8 sps:$4 sm:$0xff]   ;;  %v959_v16 = vld [vmem:[#allocation7 + $0x10] ss:$8 sps:$4 sm:$0xff]   ;;  %v967_v18 = vld [vmem:[#allocation7 + $0x24] ss:$8 sps:$4 sm:$0xff]  }
  0x5f   :  { %v962_v17 = vld [vmem:[#allocation8 + $0x10] ss:$8 sps:$4 sm:$0xff]   ;;  %v970_v19 = vld [vmem:[#allocation8 + $0x24] ss:$8 sps:$4 sm:$0xff]   ;;  %v965_v20 = vld [vmem:[#allocation7 + $0x20] ss:$8 sps:$4 sm:$0xff]  }
  0x60   :  { %151 = vmatpush1.bf16.msra.mxu1 %v950_v7  ;;  %513 = vmatpush1.bf16.msra.mxu0 %v951_v8  ;;  %v968_v21 = vld [vmem:[#allocation8 + $0x20] ss:$8 sps:$4 sm:$0xff]   ;;  %v973_v22 = vld [vmem:[#allocation7 + $0x34] ss:$8 sps:$4 sm:$0xff]   ;;  %v971_v24 = vld [vmem:[#allocation7 + $0x30] ss:$8 sps:$4 sm:$0xff]  }
  0x61   :  { %401 = vmatprep.subr.bf16.mxu1 %v955_v11  ;;  %763 = vmatprep.subr.bf16.mxu0 %v958_v13  ;;  %v976_v23 = vld [vmem:[#allocation8 + $0x34] ss:$8 sps:$4 sm:$0xff]   ;;  %v974_v25 = vld [vmem:[#allocation8 + $0x30] ss:$8 sps:$4 sm:$0xff]   ;;  %v979_v26 = vld [vmem:[#allocation7 + $0x44] ss:$8 sps:$4 sm:$0xff]  }
  0x62   :  { %v982_v27 = vld [vmem:[#allocation8 + $0x44] ss:$8 sps:$4 sm:$0xff]   ;;  %v977_v28 = vld [vmem:[#allocation7 + $0x40] ss:$8 sps:$4 sm:$0xff]   ;;  %v985_v30 = vld [vmem:[#allocation7 + $0x54] ss:$8 sps:$4 sm:$0xff]  }
  0x63   :  { %856 = vmatmul.mubr.msk.bf16.vlgmr.msra.gmra.mrb[0].mxu1 %vm144_vm0, %v952_v9  ;;  %893 = vmatmul.mubr.msk.bf16.vlgmr.msra.gmra.mrb[0].mxu0 %vm144_vm0, %v952_v9  ;;  %v980_v29 = vld [vmem:[#allocation8 + $0x40] ss:$8 sps:$4 sm:$0xff]   ;;  %v988_v31 = vld [vmem:[#allocation8 + $0x54] ss:$8 sps:$4 sm:$0xff]   ;;  %v983_v32 = vld [vmem:[#allocation7 + $0x50] ss:$8 sps:$4 sm:$0xff]  }
  0x64   :  { %402 = vmatpush1.bf16.msra.mxu1 %v953_v10  ;;  %764 = vmatpush1.bf16.msra.mxu0 %v956_v12  ;;  %v986_v33 = vld [vmem:[#allocation8 + $0x50] ss:$8 sps:$4 sm:$0xff]   ;;  %v991_v34 = vld [vmem:[#allocation7 + $0x64] ss:$8 sps:$4 sm:$0xff]   ;;  %v989_v36 = vld [vmem:[#allocation7 + $0x60] ss:$8 sps:$4 sm:$0xff]   ;;  %v109_v10 = vlaneseq }
  0x65   :  { %403 = vmatprep.subr.bf16.mxu1 %v961_v14  ;;  %765 = vmatprep.subr.bf16.mxu0 %v964_v15  ;;  %v994_v35 = vld [vmem:[#allocation8 + $0x64] ss:$8 sps:$4 sm:$0xff]   ;;  %v992_v37 = vld [vmem:[#allocation8 + $0x60] ss:$8 sps:$4 sm:$0xff]   ;;  %v997_v38 = vld [vmem:[#allocation7 + $0x74] ss:$8 sps:$4 sm:$0xff]  }
  0x66   :  { %v1000_v39 = vld [vmem:[#allocation8 + $0x74] ss:$8 sps:$4 sm:$0xff]   ;;  %v995_v40 = vld [vmem:[#allocation7 + $0x70] ss:$8 sps:$4 sm:$0xff]   ;;  %v1003_v42 = vld [vmem:[#allocation7 + $0x84] ss:$8 sps:$4 sm:$0xff]  }
  0x67   :  { %v998_v41 = vld [vmem:[#allocation8 + $0x70] ss:$8 sps:$4 sm:$0xff]   ;;  %v1006_v43 = vld [vmem:[#allocation8 + $0x84] ss:$8 sps:$4 sm:$0xff]   ;;  %v1001_v44 = vld [vmem:[#allocation7 + $0x80] ss:$8 sps:$4 sm:$0xff]  }
  0x68   :  { %404 = vmatpush1.bf16.msra.mxu1 %v959_v16  ;;  %766 = vmatpush1.bf16.msra.mxu0 %v962_v17  ;;  %v1004_v45 = vld [vmem:[#allocation8 + $0x80] ss:$8 sps:$4 sm:$0xff]   ;;  %v1009_v46 = vld [vmem:[#allocation7 + $0x94] ss:$8 sps:$4 sm:$0xff]   ;;  %v1007_v48 = vld [vmem:[#allocation7 + $0x90] ss:$8 sps:$4 sm:$0xff]  }
  0x69   :  { %405 = vmatprep.subr.bf16.mxu1 %v967_v18  ;;  %767 = vmatprep.subr.bf16.mxu0 %v970_v19  ;;  %v1012_v47 = vld [vmem:[#allocation8 + $0x94] ss:$8 sps:$4 sm:$0xff]   ;;  %v1010_v49 = vld [vmem:[#allocation8 + $0x90] ss:$8 sps:$4 sm:$0xff]   ;;  %v1015_v50 = vld [vmem:[#allocation7 + $0xa4] ss:$8 sps:$4 sm:$0xff]  }
  0x6a   :  { %v1018_v51 = vld [vmem:[#allocation8 + $0xa4] ss:$8 sps:$4 sm:$0xff]   ;;  %v1013_v52 = vld [vmem:[#allocation7 + $0xa0] ss:$8 sps:$4 sm:$0xff]   ;;  %v1021_v54 = vld [vmem:[#allocation7 + $0xb4] ss:$8 sps:$4 sm:$0xff]  }
  0x6b   :  { %v1016_v53 = vld [vmem:[#allocation8 + $0xa0] ss:$8 sps:$4 sm:$0xff]   ;;  %v1024_v55 = vld [vmem:[#allocation8 + $0xb4] ss:$8 sps:$4 sm:$0xff]   ;;  %v1019_v56 = vld [vmem:[#allocation7 + $0xb0] ss:$8 sps:$4 sm:$0xff]  }
  0x6c   :  { %406 = vmatpush1.bf16.msra.mxu1 %v965_v20  ;;  %768 = vmatpush1.bf16.msra.mxu0 %v968_v21  ;;  %v1022_v57 = vld [vmem:[#allocation8 + $0xb0] ss:$8 sps:$4 sm:$0xff]   ;;  %v1027_v58 = vld [vmem:[#allocation7 + $0xc4] ss:$8 sps:$4 sm:$0xff]   ;;  %v1025_v60 = vld [vmem:[#allocation7 + $0xc0] ss:$8 sps:$4 sm:$0xff]  }
  0x6d   :  { %407 = vmatprep.subr.bf16.mxu1 %v973_v22  ;;  %769 = vmatprep.subr.bf16.mxu0 %v976_v23  ;;  %v1030_v59 = vld [vmem:[#allocation8 + $0xc4] ss:$8 sps:$4 sm:$0xff]   ;;  %v1028_v61 = vld [vmem:[#allocation8 + $0xc0] ss:$8 sps:$4 sm:$0xff]   ;;  %v1033_v62 = vld [vmem:[#allocation7 + $0xd4] ss:$8 sps:$4 sm:$0xff]  }
  0x6e   :  { %v1036_v63 = vld [vmem:[#allocation8 + $0xd4] ss:$8 sps:$4 sm:$0xff]   ;;  %v1031_v0 = vld [vmem:[#allocation7 + $0xd0] ss:$8 sps:$4 sm:$0xff]   ;;  %v1039_v2 = vld [vmem:[#allocation7 + $0xe4] ss:$8 sps:$4 sm:$0xff]  }
  0x6f   :  { %v1034_v1 = vld [vmem:[#allocation8 + $0xd0] ss:$8 sps:$4 sm:$0xff]   ;;  %v1042_v3 = vld [vmem:[#allocation8 + $0xe4] ss:$8 sps:$4 sm:$0xff]   ;;  %v1037_v4 = vld [vmem:[#allocation7 + $0xe0] ss:$8 sps:$4 sm:$0xff]  }
  0x70   :  { %408 = vmatpush1.bf16.msra.mxu1 %v971_v24  ;;  %770 = vmatpush1.bf16.msra.mxu0 %v974_v25  ;;  %v1040_v5 = vld [vmem:[#allocation8 + $0xe0] ss:$8 sps:$4 sm:$0xff]   ;;  %v1045_v6 = vld [vmem:[#allocation7 + $0xf4] ss:$8 sps:$4 sm:$0xff]   ;;  %v1043_v8 = vld [vmem:[#allocation7 + $0xf0] ss:$8 sps:$4 sm:$0xff]  }
  0x71   :  { %409 = vmatprep.subr.bf16.mxu1 %v979_v26  ;;  %771 = vmatprep.subr.bf16.mxu0 %v982_v27  ;;  %v1048_v7 = vld [vmem:[#allocation8 + $0xf4] ss:$8 sps:$4 sm:$0xff]   ;;  %v1046_v9 = vld [vmem:[#allocation8 + $0xf0] ss:$8 sps:$4 sm:$0xff]   ;;  %v110_v11 = vshrl.u32 %v109_v10, 7  ;;  %vm840_vm2 = vcmask 15360  }
  0x72   :  { %v107_v13 = vld [vmem:[%s1296_s2] sm:$0x3]  ;;  %v478_v14 = vld [vmem:[%s1296_s2 + $0x2] sm:$0x3] }
  0x73   :  { %v111_v12 = vsub.s32 0, %v110_v11  ;;  %v115_v15 = vsub.s32 1, %v110_v11 }
  0x74   :  { %410 = vmatpush1.bf16.msra.mxu1 %v977_v28  ;;  %772 = vmatpush1.bf16.msra.mxu0 %v980_v29 }
  0x75   :  { %411 = vmatprep.subr.bf16.mxu1 %v985_v30  ;;  %773 = vmatprep.subr.bf16.mxu0 %v988_v31  ;;  %v112_v16 = vrot.slane %v107_v13, %v111_v12  ;;  %v483_v17 = vrot.slane %v478_v14, %v111_v12  ;;  %v116_v18 = vrot.slane %v107_v13, %v115_v15 }
  0x76   :  { %v487_v19 = vrot.slane %v478_v14, %v115_v15 }
  0x78   :  { %412 = vmatpush1.bf16.msra.mxu1 %v983_v32  ;;  %774 = vmatpush1.bf16.msra.mxu0 %v986_v33 }
  0x79   :  { %413 = vmatprep.subr.bf16.mxu1 %v991_v34  ;;  %775 = vmatprep.subr.bf16.mxu0 %v994_v35 }
  0x7c   :  { %414 = vmatpush1.bf16.msra.mxu1 %v989_v36  ;;  %776 = vmatpush1.bf16.msra.mxu0 %v992_v37 }
  0x7d   :  { %415 = vmatprep.subr.bf16.mxu1 %v997_v38  ;;  %777 = vmatprep.subr.bf16.mxu0 %v1000_v39 }
  0x80   :  { %416 = vmatpush1.bf16.msra.mxu1 %v995_v40  ;;  %778 = vmatpush1.bf16.msra.mxu0 %v998_v41 }
  0x81   :  { %417 = vmatprep.subr.bf16.mxu1 %v1003_v42  ;;  %779 = vmatprep.subr.bf16.mxu0 %v1006_v43 }
  0x84   :  { %418 = vmatpush1.bf16.msra.mxu1 %v1001_v44  ;;  %780 = vmatpush1.bf16.msra.mxu0 %v1004_v45 }
  0x85   :  { %419 = vmatprep.subr.bf16.mxu1 %v1009_v46  ;;  %781 = vmatprep.subr.bf16.mxu0 %v1012_v47 }
  0x88   :  { %420 = vmatpush1.bf16.msra.mxu1 %v1007_v48  ;;  %782 = vmatpush1.bf16.msra.mxu0 %v1010_v49  ;;  %v229_v48 = vld [vmem:[%s1298_s4] sm:$0x3]  ;;  %s927_s4 = sld [smem:[#allocation10 + $0x1]] }
  0x89   :  { %421 = vmatprep.subr.bf16.mxu1 %v1015_v50  ;;  %783 = vmatprep.subr.bf16.mxu0 %v1018_v51  ;;  %v591_v49 = vld [vmem:[%s1300_s6] sm:$0x3]  ;;  %v234_v50 = vrot.slane %v229_v48, %v111_v12  ;;  %s470_s6 = sld [smem:[#allocation10]] }
  0x8a   :  { %v596_v51 = vrot.slane %v591_v49, %v111_v12 }
  0x8c   :  { %422 = vmatpush1.bf16.msra.mxu1 %v1013_v52  ;;  %784 = vmatpush1.bf16.msra.mxu0 %v1016_v53  ;;  %v238_v52 = vrot.slane %v229_v48, %v115_v15  ;;  %v600_v53 = vrot.slane %v591_v49, %v115_v15 }
  0x8d   :  { %423 = vmatprep.subr.bf16.mxu1 %v1021_v54  ;;  %785 = vmatprep.subr.bf16.mxu0 %v1024_v55  ;;  %v448_v54 = vld [vmem:[%s1301_s7] ss:$2 sm:$0x3]  ;;  %v926_v55 = vld [vmem:[%s1301_s7 + $0x1] ss:$2 sm:$0x3] }
  0x90   :  { %424 = vmatpush1.bf16.msra.mxu1 %v1019_v56  ;;  %786 = vmatpush1.bf16.msra.mxu0 %v1022_v57 }
  0x91   :  { %425 = vmatprep.subr.bf16.mxu1 %v1027_v58  ;;  %787 = vmatprep.subr.bf16.mxu0 %v1030_v59 }
  0x94   :  { %426 = vmatpush1.bf16.msra.mxu1 %v1025_v60  ;;  %788 = vmatpush1.bf16.msra.mxu0 %v1028_v61 }
  0x95   :  { %427 = vmatprep.subr.bf16.mxu1 %v1033_v62  ;;  %789 = vmatprep.subr.bf16.mxu0 %v1036_v63  ;;  %v453_v62 = vrot.slane %v448_v54, %v111_v12  ;;  %v816_v63 = vrot.slane %v926_v55, %v111_v12 }
  0x98   :  { %428 = vmatpush1.bf16.msra.mxu1 %v1031_v0  ;;  %790 = vmatpush1.bf16.msra.mxu0 %v1034_v1 }
  0x99   :  { %429 = vmatprep.subr.bf16.mxu1 %v1039_v2  ;;  %791 = vmatprep.subr.bf16.mxu0 %v1042_v3 }
  0x9c   :  { %430 = vmatpush1.bf16.msra.mxu1 %v1037_v4  ;;  %792 = vmatpush1.bf16.msra.mxu0 %v1040_v5  ;;  %v457_v4 = vrot.slane %v448_v54, %v115_v15  ;;  %v820_v5 = vrot.slane %v926_v55, %v115_v15 }
  0x9d   :  { %431 = vmatprep.subr.bf16.mxu1 %v1045_v6  ;;  %793 = vmatprep.subr.bf16.mxu0 %v1048_v7 }
  0xa0   :  { %432 = vmatpush1.bf16.msra.mxu1 %v1043_v8  ;;  %794 = vmatpush1.bf16.msra.mxu0 %v1046_v9 }
 0x136   :  { %v182_v20 = vpop.f32.mrb[0].mxu1  ;;  %v544_v21 = vpop.f32.mrb[0].mxu0 }
 0x137   :  { %v183_v22 = vadd.f32 %v182_v20, %v112_v16  ;;  %v545_v23 = vadd.f32 %v544_v21, %v483_v17  ;;  %v184_v24 = vpop.f32.mrb[1].mxu1  ;;  %v546_v25 = vpop.f32.mrb[1].mxu0 }
 0x138   :  { %v185_v26 = vadd.f32 %v184_v24, %v116_v18  ;;  %v547_v27 = vadd.f32 %v546_v25, %v487_v19  ;;  %v186_v28 = vpop.f32.mrb[2].mxu1  ;;  %v548_v29 = vpop.f32.mrb[2].mxu0 }
 0x139   :  { %v187_v30 = vadd.f32 %v186_v28, %v112_v16  ;;  %v549_v31 = vadd.f32 %v548_v29, %v483_v17  ;;  %v188_v32 = vpop.f32.mrb[3].mxu1  ;;  %v550_v33 = vpop.f32.mrb[3].mxu0  ;;  %v191_v36 = vmax.f32 %v183_v22, 0.0  ;;  %v553_v37 = vmax.f32 %v545_v23, 0.0 }
 0x13a   :  { %v189_v34 = vadd.f32 %v188_v32, %v116_v18  ;;  %v551_v35 = vadd.f32 %v550_v33, %v487_v19  ;;  %v192_v40 = vmax.f32 %v185_v26, 0.0  ;;  %v554_v41 = vmax.f32 %v547_v27, 0.0 }
 0x13b   :  { %v193_v38 = vmax.f32 %v187_v30, 0.0  ;;  %v555_v39 = vmax.f32 %v549_v31, 0.0  ;;  %v834_v32 = vstv %s927_s4  ;;  %v471_v33 = vstv %s470_s6 }
 0x13c   :  { %v194_v42 = vmax.f32 %v189_v34, 0.0  ;;  %v556_v43 = vmax.f32 %v551_v35, 0.0 }
 0x13d   :  { %v195_v44 = vpack.c.bf16 %v193_v38, %v191_v36  ;;  %v557_v45 = vpack.c.bf16 %v555_v39, %v553_v37 }
 0x13e   :  { %v196_v46 = vpack.c.bf16 %v194_v42, %v192_v40  ;;  %v558_v47 = vpack.c.bf16 %v556_v43, %v554_v41 }
 0x140   :  { %433 = vmatprep.mubr.bf16.mxu1 %v196_v46  ;;  %795 = vmatprep.mubr.bf16.mxu0 %v558_v47 }
 0x141   :  { %434 = vmatmul.mubr.bf16.vlgmr.msra.gmra.mrb[4].mxu1 %v195_v44  ;;  %796 = vmatmul.mubr.bf16.vlgmr.msra.gmra.mrb[4].mxu0 %v557_v45 }
 0x214   :  { %v435_v56 = vpop.f32.mrb[4].mxu1  ;;  %v797_v57 = vpop.f32.mrb[4].mxu0 }
 0x215   :  { %v436_v58 = vadd.f32 %v435_v56, %v234_v50  ;;  %v798_v59 = vadd.f32 %v797_v57, %v596_v51  ;;  %v437_v60 = vpop.f32.mrb[5].mxu1  ;;  %v799_v61 = vpop.f32.mrb[5].mxu0 }
 0x216   :  { %v438_v0 = vadd.f32 %v437_v60, %v238_v52  ;;  %v800_v1 = vadd.f32 %v799_v61, %v600_v53  ;;  %v439_v2 = vpop.f32.mrb[6].mxu1  ;;  %v801_v3 = vpop.f32.mrb[6].mxu0 }
 0x217   :  { %v444_v6 = vmax.f32 %v436_v58, 0.0  ;;  %v806_v7 = vmax.f32 %v798_v59, 0.0  ;;  %v440_v8 = vadd.f32 %v439_v2, %v234_v50  ;;  %v802_v9 = vadd.f32 %v801_v3, %v596_v51  ;;  %v441_v10 = vpop.f32.mrb[7].mxu1  ;;  %v803_v11 = vpop.f32.mrb[7].mxu0 }
 0x218   :  { %v445_v13 = vmax.f32 %v438_v0, 0.0  ;;  %v807_v14 = vmax.f32 %v800_v1, 0.0  ;;  %v442_v16 = vadd.f32 %v441_v10, %v238_v52  ;;  %v804_v17 = vadd.f32 %v803_v11, %v600_v53 }
 0x219   :  { %v446_v18 = vmax.f32 %v440_v8, 0.0  ;;  %v808_v19 = vmax.f32 %v802_v9, 0.0  ;;  %v823_v20 = vmul.f32 %v816_v63, %v806_v7  ;;  %v460_v12 = vmul.f32 %v453_v62, %v444_v6 }
 0x21a   :  { %v447_v21 = vmax.f32 %v442_v16, 0.0  ;;  %v809_v22 = vmax.f32 %v804_v17, 0.0  ;;  %v824_v23 = vmul.f32 %v820_v5, %v807_v14  ;;  %v461_v24 = vmul.f32 %v457_v4, %v445_v13 }
 0x21b   :  { %v462_v25 = vmul.f32 %v453_v62, %v446_v18  ;;  %v825_v15 = vmul.f32 %v816_v63, %v808_v19 }
 0x21c   :  { %v463_v26 = vmul.f32 %v457_v4, %v447_v21  ;;  %v826_v27 = vmul.f32 %v820_v5, %v809_v22  ;;  %v827_v28 = vadd.f32 %v824_v23, %v823_v20  ;;  %v464_v29 = vadd.f32 %v461_v24, %v460_v12 }
 0x21e   :  { %828 = vadd.xlane.f32.xlu1 %v827_v28  ;;  %465 = vadd.xlane.f32.xlu0 %v464_v29  ;;  %v830_v30 = vadd.f32 %v826_v27, %v825_v15  ;;  %v467_v31 = vadd.f32 %v463_v26, %v462_v25 }
 0x222   :  { %831 = vadd.xlane.f32.xlu1 %v830_v30  ;;  %468 = vadd.xlane.f32.xlu0 %v467_v31 }
 0x2ab   :  { %v829_v34 = vpop.xlane.xlu1 %828  ;;  %v466_v35 = vpop.xlane.xlu0 %465 }
 0x2ac   :  { %v835_v36 = vadd.f32 %v834_v32, %v829_v34  ;;  %v472_v37 = vadd.f32 %v471_v33, %v466_v35 }
 0x2ae   :  { %v838_v38 = vsel %vm837_vm1, %v472_v37, %v835_v36 }
 0x2af   :  { %841 = vst.msk [vmem:[%s1303_s9] sm:$0xff] %vm840_vm2, %v838_v38  ;;  %v832_v39 = vpop.xlane.xlu1 %831  ;;  %v469_v40 = vpop.xlane.xlu0 %468 }
 0x2b0   :  { %v836_v41 = vadd.f32 %v834_v32, %v832_v39  ;;  %v473_v42 = vadd.f32 %v471_v33, %v469_v40 }
 0x2b2   :  { %v839_v43 = vsel %vm837_vm1, %v473_v42, %v836_v41 }
 0x2b3   :  { %842 = vst.msk [vmem:[%s1303_s9 + $0x8] sm:$0xff] %vm840_vm2, %v839_v43 }
 0x2b4   :  { %847 = vsyncpa [#allocation3], 1 }
 0x2b5   :  { %848 = vsyncpa [#allocation6], 1 }
 0x2b6   :  { %849 = vsyncpa [#allocation9], 1 }
 0x2b7   :  { %850 = vsyncpa [#allocation4], 1 }

</bundles_post_ra>
